<compile_context>
chip_gen: v6e
topology: v6e:2x2x1
jax: 0.10.0
libtpu: 0.0.40
codegen_flags: <defaults>
</compile_context>

<pallas_src>
import jax
import jax.numpy as jnp
import numpy as np
from jax.experimental import pallas as pl
from jax.experimental.pallas import tpu as pltpu


_LANE = 128
_SUBLANE = 8
# ~4 MiB per block => double-buffered in+out footprint = 16 MiB.
_TARGET_BLOCK_BYTES = 4 * 1024 * 1024
# Explicit scoped-VMEM limit: safe on v5e (default scoped is only 16 MiB) and
# well under v7x's 64 MiB physical VMEM per TensorCore.
_VMEM_LIMIT_BYTES = 32 * 1024 * 1024


# ----------------------------------------------------------------------------
# Direct HBM -> HBM DMA copy (no VMEM round-trip, no grid).
# ----------------------------------------------------------------------------
def _dma_copy_kernel(x_hbm, o_hbm, sem):
    cp = pltpu.make_async_copy(x_hbm, o_hbm, sem)
    cp.start()
    cp.wait()


def _dma_copy(x: jax.Array) -> jax.Array:
    return pl.pallas_call(
        _dma_copy_kernel,
        out_shape=jax.ShapeDtypeStruct(x.shape, x.dtype),
        in_specs=[pl.BlockSpec(memory_space=pl.ANY)],
        out_specs=pl.BlockSpec(memory_space=pl.ANY),
        scratch_shapes=[pltpu.SemaphoreType.DMA(())],
    )(x)


# ----------------------------------------------------------------------------
# Tiled lane-dense VMEM copy (alternative materialized path).
# ----------------------------------------------------------------------------
def _vmem_copy_kernel(x_ref, o_ref):
    o_ref[...] = x_ref[...]


def _choose_cols(n: int):
    # Widest lane-dense trailing dim that divides n (lane-dense output width is
    # the biggest single measured lever for store efficiency).
    for cand in (32768, 16384, 8192, 4096, 2048, 1024, 512, 256, 128):
        if n % cand == 0:
            return cand
    return None


def _choose_block_rows(rows: int, cols: int, itemsize: int) -> int:
    if rows < 2 * _SUBLANE:
        return rows  # single full-array block (always legal)
    # Target ~_TARGET_BLOCK_BYTES per block, sublane-aligned.
    target = max(
        _SUBLANE,
        (_TARGET_BLOCK_BYTES // (cols * itemsize)) // _SUBLANE * _SUBLANE,
    )
    # Ensure at least two grid steps so both v7x TensorCores get work
    # (neutral on single-TC v5e/v6e).
    half = max(_SUBLANE, (rows // 2) // _SUBLANE * _SUBLANE)
    target = min(target, half, rows)
    # Prefer an exact divisor of rows (unmasked last tile), but never shrink
    # the block by more than ~2x to obtain one.
    br = (target // _SUBLANE) * _SUBLANE
    lower = max(_SUBLANE, target // 2)
    while br >= lower:
        if rows % br == 0:
            return br
        br -= _SUBLANE
    return target  # ragged last tile; still correct.


def _vmem_tiled_copy_2d(x2: jax.Array) -> jax.Array:
    rows, cols = x2.shape
    itemsize = jnp.dtype(x2.dtype).itemsize
    block_rows = _choose_block_rows(rows, cols, itemsize)
    grid = (pl.cdiv(rows, block_rows),)
    return pl.pallas_call(
        _vmem_copy_kernel,
        out_shape=jax.ShapeDtypeStruct((rows, cols), x2.dtype),
        grid=grid,
        in_specs=[pl.BlockSpec((block_rows, cols), lambda i: (i, 0))],
        out_specs=pl.BlockSpec((block_rows, cols), lambda i: (i, 0)),
        compiler_params=pltpu.CompilerParams(
            dimension_semantics=("parallel",),
            vmem_limit_bytes=_VMEM_LIMIT_BYTES,
        ),
    )(x2)


def _vmem_copy(x: jax.Array) -> jax.Array:
    orig_shape = x.shape
    n = x.size
    cols = _choose_cols(n)
    if cols is None:
        # Non-128-divisible element count: pad the flat array up to a lane
        # multiple, run the tiled lane-dense copy, slice back.
        pad = (-n) % _LANE
        flat = jnp.pad(x.reshape(-1), (0, pad))
        cols = _choose_cols(flat.size)
        out = _vmem_tiled_copy_2d(flat.reshape(flat.size // cols, cols))
        return out.reshape(-1)[:n].reshape(orig_shape)
    return _vmem_tiled_copy_2d(x.reshape(n // cols, cols)).reshape(orig_shape)


# ----------------------------------------------------------------------------
# Public API
# ----------------------------------------------------------------------------
def identity(
    x: jax.Array,
    *,
    materialize: bool = False,
    donate: bool = False,
    method: str = "dma",
) -> jax.Array:
    """Identity forward pass (`forward(x): return x`).

    Default: zero-cost passthrough — no HBM traffic (the correct lowering).
    materialize=True: produce a physically distinct output buffer via Pallas:
      method="dma"  -> single direct HBM->HBM DMA (no VMEM staging, no grid).
      method="vmem" -> lane-dense, row-tiled HBM->VMEM->HBM copy.
    donate=True: the output would alias the input buffer, making the copy a
      semantic no-op, so it is short-circuited to `return x`.
    """
    if not materialize or donate:
        return x
    if x.size == 0:
        return x
    if method == "dma":
        return _dma_copy(x)
    return _vmem_copy(x)


if __name__ == "__main__":
    key = jax.random.PRNGKey(0)
    # Small NCHW input consistent with typical use of this module.
    x = jax.random.normal(key, (2, 4, 16, 16), dtype=jnp.float32)
    x_host = np.asarray(x)

    outs = {
        "passthrough": identity(x),
        "donated": identity(x, materialize=True, donate=True),
        "dma_copy": identity(x, materialize=True, method="dma"),
        "vmem_copy": identity(x, materialize=True, method="vmem"),
    }
    jax.block_until_ready(outs)

    for name, y in outs.items():
        assert y.shape == x.shape, f"{name}: shape {y.shape} != {x.shape}"
        assert y.dtype == x.dtype, f"{name}: dtype {y.dtype} != {x.dtype}"
        assert np.array_equal(np.asarray(y), x_host), f"{name}: values differ"

    # Exercise the non-128-divisible fallback (padded lane-dense tiled copy).
    x_odd = jax.random.normal(jax.random.PRNGKey(1), (3, 5, 7), dtype=jnp.float32)
    y_odd = identity(x_odd, materialize=True, method="vmem")
    y_odd_dma = identity(x_odd, materialize=True, method="dma")
    jax.block_until_ready((y_odd, y_odd_dma))
    assert np.array_equal(np.asarray(y_odd), np.asarray(x_odd))
    assert np.array_equal(np.asarray(y_odd_dma), np.asarray(x_odd))

    print("KERNEL_OK")
</pallas_src>

<mosaic_0001>
module attributes {stable_mosaic.version = 11 : i64} {
  func.func @_dma_copy_kernel(%arg0: memref<2x4x16x16xf32, #tpu.memory_space<any>>, %arg1: memref<2x4x16x16xf32, #tpu.memory_space<any>>, %arg2: memref<!tpu.dma_semaphore, #tpu.memory_space<semaphore_mem>>) attributes {dimension_semantics = [], scalar_prefetch = 0 : i64, scratch_operands = 1 : i64, tpu.core_type = #tpu.core_type<tc>} {
    tpu.enqueue_dma source(%arg0 : memref<2x4x16x16xf32, #tpu.memory_space<any>>) target(%arg1 : memref<2x4x16x16xf32, #tpu.memory_space<any>>) target_semaphore(%arg2 : memref<!tpu.dma_semaphore, #tpu.memory_space<semaphore_mem>>)
    tpu.wait_dma2 semaphore(%arg2 : memref<!tpu.dma_semaphore, #tpu.memory_space<semaphore_mem>>) src(%arg0 : memref<2x4x16x16xf32, #tpu.memory_space<any>>) dst(%arg1 : memref<2x4x16x16xf32, #tpu.memory_space<any>>)
    return
  }
}

</mosaic_0001>

<bundles_post_ra>
// kernel: tpu_custom_call.1
= control target key start
LH: loop header
LB: loop body
LE: loop exit
PB: predicated region body
PF: predicated region fallthrough
CT: control target
= control target key end

     0   :  { %s30_s6 = smov [#allocation2]   ;;  %s31_s7 = smov 131072   ;;  %s49_s0 = inlined_call_operand.hbm [shape: f32[2,4,16,16], index: 0, kind: input, shape index: {}]   ;;  %s50_s1 = inlined_call_operand.hbm [shape: f32[2,4,16,16], index: 1, kind: output, shape index: {}]  }
   0x1   :  { %s32_s8 = smov 0  }
   0x2   :  { %12 = dma.general %s49_s0, 2048, %s50_s1, %s30_s6, %s31_s7, [#allocation4], %s32_s8, 0  }
   0x3   :  { %28 = dma.done.wait [#allocation2], 2048 }
   0x4   :  { %29 = vsyncadd [#allocation2], 4294965248 }
   0x5   :  { %18 = vsyncmov [#allocation2] }
   0x8   :  { %s19_s13 = vpop.sfrf %18 }
   0x9   :  { %p24_p0 = scmp.ne.s32.totalorder %s19_s13, 0 }
   0xb   :  { %23 = shalt.err (%p24_p0)  }

</bundles_post_ra>
